<compile_context>
chip_gen: v6e
topology: v6e:2x2x1
jax: 0.10.0
libtpu: 0.0.40
codegen_flags: <defaults>
</compile_context>

<pallas_src>
import functools

import jax
import jax.numpy as jnp
from jax import lax
from jax.experimental import pallas as pl
from jax.experimental.pallas import tpu as pltpu

LANES = 128
SUBLANES = 8


def _adv_loss_kernel(x_ref, o_ref, *, tile_rows, total_rows,
                     blocks_per_split, need_mask):
    i = pl.program_id(1)  # reduction axis (last grid axis)

    # Output block is resident across the reduction axis: init once per split.
    @pl.when(i == 0)
    def _():
        o_ref[...] = jnp.zeros_like(o_ref)

    # Cast in-kernel so HBM traffic stays at the input dtype width.
    x = x_ref[...].astype(jnp.float32)
    d = x - 1.0
    sq = d * d  # the 0.5 and 1/N factors are folded into the final scale

    if need_mask:
        # Last (partial) block: zero out rows past the valid extent.
        c = pl.program_id(0)
        block_id = c * blocks_per_split + i
        row_ids = block_id * tile_rows + lax.broadcasted_iota(
            jnp.int32, (tile_rows, LANES), 0)
        sq = jnp.where(row_ids < total_rows, sq, 0.0)

    if tile_rows % SUBLANES == 0:
        # Fold the tile into an (8, 128) vreg-shaped partial: pure VPU adds,
        # no per-step cross-lane reduce and no scalar-carried dependency.
        o_ref[...] += sq.reshape(
            tile_rows // SUBLANES, SUBLANES, LANES).sum(axis=0)
    else:
        # Tiny-input fallback (single block only): one sublane reduce is fine.
        o_ref[0:1, :] += jnp.sum(sq, axis=0, keepdims=True)


def adversarial_loss(fake_outputs, *, tile_rows=1024):
    """Computes mean((fake_outputs - 1)**2 / 2) over all elements."""
    n_total = fake_outputs.size
    flat = fake_outputs.reshape(-1)

    # Lane-tail pad only when numel % 128 != 0.  Pad value 1.0 contributes
    # exactly 0 to the sum, so no extra masking is needed for it.
    lane_pad = (-n_total) % LANES
    if lane_pad:
        flat = jnp.concatenate([flat, jnp.ones((lane_pad,), flat.dtype)])
    rows = flat.shape[0] // LANES
    x2d = flat.reshape(rows, LANES)

    tile_rows = min(tile_rows, rows)
    total_blocks = pl.cdiv(rows, tile_rows)
    need_mask = (rows % tile_rows) != 0

    # Shard the reduction stream across 2 TensorCores (v7x) when it divides
    # evenly; on single-core chips this axis is just a sequential loop.
    nsplit = 2 if (total_blocks >= 2 and total_blocks % 2 == 0) else 1
    blocks_per_split = total_blocks // nsplit

    kernel = functools.partial(
        _adv_loss_kernel,
        tile_rows=tile_rows,
        total_rows=rows,
        blocks_per_split=blocks_per_split,
        need_mask=need_mask,
    )

    partials = pl.pallas_call(
        kernel,
        out_shape=jax.ShapeDtypeStruct((nsplit * SUBLANES, LANES), jnp.float32),
        grid_spec=pltpu.PrefetchScalarGridSpec(
            num_scalar_prefetch=0,
            grid=(nsplit, blocks_per_split),
            in_specs=[pl.BlockSpec(
                (tile_rows, LANES),
                lambda c, i, bps=blocks_per_split: (c * bps + i, 0))],
            out_specs=pl.BlockSpec((SUBLANES, LANES), lambda c, i: (c, 0)),
        ),
        compiler_params=pltpu.CompilerParams(
            dimension_semantics=("parallel", "arbitrary")),
    )(x2d)

    # Single final reduce + combined (0.5 / N) scale on a tiny (nsplit*8, 128)
    # lane-dense partial buffer.
    return jnp.sum(partials) * (0.5 / float(n_total))


if __name__ == "__main__":
    key = jax.random.PRNGKey(0)

    def check(x, **kw):
        loss = adversarial_loss(x, **kw)
        jax.block_until_ready(loss)
        ref = jnp.mean((x.astype(jnp.float32) - 1.0) ** 2 / 2.0)
        assert jnp.allclose(loss, ref, rtol=1e-5, atol=1e-6), (loss, ref)

    # 1) main case: NCHW discriminator output (2, 4, 16, 16)
    x1 = jax.random.normal(key, (2, 4, 16, 16), dtype=jnp.float32)
    check(x1)

    # 2) odd element count -> lane-tail pad + tiny-input fallback path
    x2 = jax.random.normal(jax.random.PRNGKey(1), (3, 5, 7, 11),
                           dtype=jnp.float32)
    check(x2)

    # 3) multi-block + 2-way split path (small tile_rows to force it)
    x3 = jax.random.normal(jax.random.PRNGKey(2), (4, 8, 32, 32),
                           dtype=jnp.float32)
    check(x3, tile_rows=64)

    # 4) partial last block -> in-kernel row masking path
    check(x3, tile_rows=96)

    print("KERNEL_OK")
</pallas_src>

<mosaic_0001>
module attributes {stable_mosaic.version = 11 : i64} {
  func.func @_adv_loss_kernel(%arg0: i32, %arg1: i32, %arg2: memref<16x128xf32, #tpu.memory_space<vmem>>, %arg3: memref<8x128xf32, #tpu.memory_space<vmem>>) attributes {dimension_semantics = [#tpu.dimension_semantics<parallel>, #tpu.dimension_semantics<arbitrary>], iteration_bounds = array<i64: 1, 1>, scalar_prefetch = 0 : i64, scratch_operands = 0 : i64, tpu.core_type = #tpu.core_type<tc>, window_params = [{transform_indices = @transform_0, window_bounds = array<i64: 16, 128>}, {transform_indices = @transform_1, window_bounds = array<i64: 8, 128>}]} {
    %c0_i32 = arith.constant 0 : i32
    %0 = arith.cmpi eq, %arg1, %c0_i32 : i32
    %1 = arith.extui %0 : i1 to i32
    %c0_i32_0 = arith.constant 0 : i32
    %2 = arith.cmpi ne, %1, %c0_i32_0 : i32
    scf.if %2 {
      %cst_7 = arith.constant 0.000000e+00 : f32
      %12 = vector.broadcast %cst_7 : f32 to vector<8x128xf32>
      %c0_8 = arith.constant 0 : index
      %c0_9 = arith.constant 0 : index
      %13 = vector.load %arg3[%c0_8, %c0_9] : memref<8x128xf32, #tpu.memory_space<vmem>>, vector<8x128xf32>
      tpu.vector_store %arg3[%c0_8, %c0_9], %12 {strides = array<i32>} : memref<8x128xf32, #tpu.memory_space<vmem>>, vector<8x128xf32>,
    } else {
    }
    %c0 = arith.constant 0 : index
    %c0_1 = arith.constant 0 : index
    %3 = vector.load %arg2[%c0, %c0_1] : memref<16x128xf32, #tpu.memory_space<vmem>>, vector<16x128xf32>
    %cst = arith.constant 1.000000e+00 : f32
    %4 = vector.broadcast %cst : f32 to vector<16x128xf32>
    %5 = arith.subf %3, %4 : vector<16x128xf32>
    %6 = arith.mulf %5, %5 : vector<16x128xf32>
    %c0_2 = arith.constant 0 : index
    %c0_3 = arith.constant 0 : index
    %7 = vector.load %arg3[%c0_2, %c0_3] : memref<8x128xf32, #tpu.memory_space<vmem>>, vector<8x128xf32>
    %8 = vector.shape_cast %6 : vector<16x128xf32> to vector<2x8x128xf32>
    %cst_4 = arith.constant dense<0.000000e+00> : vector<8x128xf32>
    %9 = vector.multi_reduction <add>, %8, %cst_4 [0] : vector<2x8x128xf32> to vector<8x128xf32>
    %10 = arith.addf %7, %9 : vector<8x128xf32>
    %c0_5 = arith.constant 0 : index
    %c0_6 = arith.constant 0 : index
    %11 = vector.load %arg3[%c0_5, %c0_6] : memref<8x128xf32, #tpu.memory_space<vmem>>, vector<8x128xf32>
    tpu.vector_store %arg3[%c0_5, %c0_6], %10 {strides = array<i32>} : memref<8x128xf32, #tpu.memory_space<vmem>>, vector<8x128xf32>,
    return
  }
  func.func @transform_0(%arg0: i32, %arg1: i32) -> (i32, i32) {
    %c1_i32 = arith.constant 1 : i32
    %0 = arith.muli %arg0, %c1_i32 : i32
    %1 = arith.addi %0, %arg1 : i32
    %c0_i32 = arith.constant 0 : i32
    %c0_i32_0 = arith.constant 0 : i32
    return %1, %c0_i32 : i32, i32
  }
  func.func @transform_1(%arg0: i32, %arg1: i32) -> (i32, i32) {
    %c0_i32 = arith.constant 0 : i32
    %c0_i32_0 = arith.constant 0 : i32
    return %arg0, %c0_i32 : i32, i32
  }
}

</mosaic_0001>

<bundles_post_ra>
// kernel: tpu_custom_call.1
= control target key start
LH: loop header
LB: loop body
LE: loop exit
PB: predicated region body
PF: predicated region fallthrough
CT: control target
= control target key end

     0   :  { %6 = vsyncpa [#allocation3], 0  ;;  %s130_s0 = inlined_call_operand.hbm [shape: f32[16,128], index: 0, kind: input, shape index: {}]   ;;  %s131_s1 = inlined_call_operand.hbm [shape: f32[8,128], index: 1, kind: output, shape index: {}]  }
   0x1   :  { %7 = vsyncpa [#allocation4], 0  ;;  %s110_s6 = smov [#allocation2]  }
   0x2   :  { %s17_s7 = sshll.u32 %s110_s6, 4  ;;  %s18_s7 = int_to_ptr.vmem [resolvable:$true] %s17_s7 }
   0x3   :  { %s74_s8 = scalar_lea.vmem %s18_s7, 256  ;;  %p79_p1 = scmp.lt.s32.totalorder %s18_s7, %s18_s7 }
   0x4   :  { %p75_p0 = scmp.ne.s32.totalorder %s18_s7, %s74_s8  ;;  %p80_p2 = scmp.lt.s32.totalorder %s74_s8, %s74_s8 }
   0x6   :  { %p81_p3 = por %p80_p2, %p79_p1 }
   0x8   :  { %p82_p4 = pnand %p81_p3, %p75_p0 }
   0xa   :  { %85 = shalt.err (!%p82_p4)
}
   0xb   :  { %s111_s9 = smov 128   ;;  %s112_s10 = smov 8  }
   0xc   :  { %23 = dma.hbm_to_vmem [thread:$0]  %s130_s0, 256, %s18_s7, [#allocation3], %s111_s9, %s111_s9, %s112_s10  }
   0xd   :  { %106 = dma.done.wait [#allocation3], 256  }
   0xe   :  { %107 = vsyncadd [#allocation3], 4294967040  ;;  %v34_v0 = vld [vmem:[#allocation2] sm:$0xff]  ;;  %v35_v1 = vld [vmem:[#allocation2 + $0x8] sm:$0xff]  ;;  %s113_s13 = smov [#allocation5]  }
   0xf   :  { %v59_v2 = vadd.f32 -1.0, %v34_v0  ;;  %v60_v3 = vadd.f32 -1.0, %v35_v1  ;;  %s50_s14 = sshll.u32 %s113_s13, 4  ;;  %s51_s14 = int_to_ptr.vmem [resolvable:$true] %s50_s14 }
  0x10   :  { %s86_s15 = scalar_lea.vmem %s51_s14, 128  ;;  %p91_p6 = scmp.lt.s32.totalorder %s51_s14, %s51_s14 }
  0x11   :  { %v38_v4 = vmul.f32 %v59_v2, %v59_v2  ;;  %v39_v5 = vmul.f32 %v60_v3, %v60_v3  ;;  %p87_p5 = scmp.ne.s32.totalorder %s51_s14, %s86_s15  ;;  %p92_p7 = scmp.lt.s32.totalorder %s86_s15, %s86_s15 }
  0x13   :  { %v41_v6 = vadd.f32 %v39_v5, %v38_v4  ;;  %p93_p8 = por %p92_p7, %p91_p6 }
  0x15   :  { %43 = vst [vmem:[#allocation5] sm:$0xff] %v41_v6  ;;  %p94_p9 = pnand %p93_p8, %p87_p5 }
  0x17   :  { %97 = shalt.err (!%p94_p9)
}
  0x18   :  { %53 = dma.vmem_to_hbm [thread:$0]  %s51_s14, 128, %s131_s1, [#allocation4]  }
  0x19   :  { %108 = dma.done.wait [#allocation4], 128  }
  0x1a   :  { %109 = vsyncadd [#allocation4], 4294967168 }
  0x1b   :  { %57 = vsyncpa [#allocation3], 1 }
  0x1c   :  { %58 = vsyncpa [#allocation4], 1 }

</bundles_post_ra>
